<compile_context>
chip_gen: v7x
topology: tpu7x:2x2x1
jax: 0.10.0
libtpu: 0.0.40
codegen_flags: <defaults>
</compile_context>

<pallas_src>
import math

import jax
import jax.numpy as jnp
from jax.experimental import pallas as pl
from jax.experimental.pallas import tpu as pltpu


# ---------------------------------------------------------------------------
# kernel
# ---------------------------------------------------------------------------
def pe_add_kernel(x_ref, pe_ref, o_ref):
    # x_ref: (TS, B, D)  pe_ref: (TS, D)  o_ref: (TS, B, D)
    # nn.Dropout is identity in eval mode -> pure broadcast add.
    pe = pe_ref[...]                              # (TS, D)
    o_ref[...] = x_ref[...] + pe[:, None, :]      # broadcast over batch (sublane) axis


# ---------------------------------------------------------------------------
# host-side helpers
# ---------------------------------------------------------------------------
def make_pe_table(d_model: int, max_len: int = 1024) -> jnp.ndarray:
    """Equivalent to the torch buffer pe[:, 0, :] of shape (max_len, d_model)."""
    position = jnp.arange(max_len, dtype=jnp.float32)[:, None]
    div_term = jnp.exp(jnp.arange(0, d_model, 2, dtype=jnp.float32) *
                       (-math.log(10000.0) / d_model))
    pe = jnp.zeros((max_len, d_model), jnp.float32)
    pe = pe.at[:, 0::2].set(jnp.sin(position * div_term))
    pe = pe.at[:, 1::2].set(jnp.cos(position * div_term))
    return pe


def _pick_seq_tile(S: int, B: int, D: int, dtype_bytes: int,
                   budget_bytes: int = 4 << 20) -> int:
    """Largest seq tile that (a) divides S, (b) is a multiple of 8 (or == S),
    and (c) keeps one double-buffered block comfortably inside scoped VMEM."""
    block_bytes = S * B * D * dtype_bytes
    if block_bytes <= budget_bytes or S % 8 != 0:
        return S
    tile = S
    while tile % 16 == 0 and tile > 8 and tile * B * D * dtype_bytes > budget_bytes:
        tile //= 2
    return tile


def positional_encoding_forward(x: jnp.ndarray, pe: jnp.ndarray) -> jnp.ndarray:
    """x: (seq_len, batch, d_model); pe: (max_len, d_model) precomputed table."""
    S, B, D = x.shape
    assert pe.shape[0] >= S and pe.shape[1] == D

    pe_s = pe[:S]                                  # (S, D), indexed by seq position
    seq_tile = _pick_seq_tile(S, B, D, x.dtype.itemsize)
    grid = (S // seq_tile,)

    return pl.pallas_call(
        pe_add_kernel,
        out_shape=jax.ShapeDtypeStruct((S, B, D), x.dtype),
        grid=grid,
        in_specs=[
            pl.BlockSpec((seq_tile, B, D), lambda i: (i, 0, 0)),
            pl.BlockSpec((seq_tile, D), lambda i: (i, 0)),
        ],
        out_specs=pl.BlockSpec((seq_tile, B, D), lambda i: (i, 0, 0)),
        compiler_params=pltpu.CompilerParams(
            dimension_semantics=("parallel",),
        ),
    )(x, pe_s)


# ---------------------------------------------------------------------------
if __name__ == "__main__":
    SEQ_LEN, BATCH, D_MODEL = 16, 4, 128       # [seq_len, batch, embedding_dim]
    MAX_LEN = 1024

    key = jax.random.PRNGKey(0)
    x = jax.random.normal(key, (SEQ_LEN, BATCH, D_MODEL), jnp.float32)

    pe = make_pe_table(D_MODEL, MAX_LEN)

    out = positional_encoding_forward(x, pe)
    out = jax.block_until_ready(out)

    # pure-JAX reference: x + pe[:S] broadcast over batch (dropout = identity in eval)
    ref = x + pe[:SEQ_LEN][:, None, :]

    assert out.shape == x.shape and out.dtype == x.dtype
    assert bool(jnp.all(jnp.isfinite(out)))
    assert bool(jnp.allclose(out, ref, atol=1e-6, rtol=1e-6))
    print("KERNEL_OK")
</pallas_src>

<mosaic_0001>
module attributes {stable_mosaic.version = 11 : i64} {
  func.func @pe_add_kernel(%arg0: i32, %arg1: memref<16x4x128xf32, #tpu.memory_space<vmem>>, %arg2: memref<16x128xf32, #tpu.memory_space<vmem>>, %arg3: memref<16x4x128xf32, #tpu.memory_space<vmem>>) attributes {dimension_semantics = [#tpu.dimension_semantics<parallel>], iteration_bounds = array<i64: 1>, scalar_prefetch = 0 : i64, scratch_operands = 0 : i64, tpu.core_type = #tpu.core_type<tc>, window_params = [{transform_indices = @transform_0, window_bounds = array<i64: 16, 4, 128>}, {transform_indices = @transform_1, window_bounds = array<i64: 16, 128>}, {transform_indices = @transform_2, window_bounds = array<i64: 16, 4, 128>}]} {
    %c0 = arith.constant 0 : index
    %c0_0 = arith.constant 0 : index
    %0 = vector.load %arg2[%c0, %c0_0] : memref<16x128xf32, #tpu.memory_space<vmem>>, vector<16x128xf32>
    %c0_1 = arith.constant 0 : index
    %c0_2 = arith.constant 0 : index
    %c0_3 = arith.constant 0 : index
    %1 = vector.load %arg1[%c0_1, %c0_2, %c0_3] : memref<16x4x128xf32, #tpu.memory_space<vmem>>, vector<16x4x128xf32>
    %2 = vector.shape_cast %0 : vector<16x128xf32> to vector<16x1x128xf32>
    %3 = vector.broadcast %2 : vector<16x1x128xf32> to vector<16x4x128xf32>
    %4 = arith.addf %1, %3 : vector<16x4x128xf32>
    %c0_4 = arith.constant 0 : index
    %c0_5 = arith.constant 0 : index
    %c0_6 = arith.constant 0 : index
    %5 = vector.load %arg3[%c0_4, %c0_5, %c0_6] : memref<16x4x128xf32, #tpu.memory_space<vmem>>, vector<16x4x128xf32>
    tpu.vector_store %arg3[%c0_4, %c0_5, %c0_6], %4 {strides = array<i32>} : memref<16x4x128xf32, #tpu.memory_space<vmem>>, vector<16x4x128xf32>,
    return
  }
  func.func @transform_0(%arg0: i32) -> (i32, i32, i32) {
    %c0_i32 = arith.constant 0 : i32
    %c0_i32_0 = arith.constant 0 : i32
    %c0_i32_1 = arith.constant 0 : i32
    return %arg0, %c0_i32, %c0_i32_0 : i32, i32, i32
  }
  func.func @transform_1(%arg0: i32) -> (i32, i32) {
    %c0_i32 = arith.constant 0 : i32
    %c0_i32_0 = arith.constant 0 : i32
    return %arg0, %c0_i32 : i32, i32
  }
  func.func @transform_2(%arg0: i32) -> (i32, i32, i32) {
    %c0_i32 = arith.constant 0 : i32
    %c0_i32_0 = arith.constant 0 : i32
    %c0_i32_1 = arith.constant 0 : i32
    return %arg0, %c0_i32, %c0_i32_0 : i32, i32, i32
  }
}

</mosaic_0001>

<bundles_post_ra>
// kernel: tpu_custom_call.1
= control target key start
LH: loop header
LB: loop body
LE: loop exit
PB: predicated region body
PF: predicated region fallthrough
CT: control target
= control target key end

     0   :  { %7 = vsyncpa [#allocation3], 0  ;;  %s467_s0 = inlined_call_operand.hbm [shape: f32[16,4,128], index: 0, kind: input, shape index: {}]   ;;  %s468_s1 = inlined_call_operand.hbm [shape: f32[16,128], index: 1, kind: input, shape index: {}]   ;;  %s469_s2 = inlined_call_operand.hbm [shape: f32[16,4,128], index: 2, kind: output, shape index: {}]  }
   0x1   :  { %8 = vsyncpa [#allocation6], 0 }
   0x2   :  { %9 = vsyncpa [#allocation4], 0  ;;  %s370_s9 = smov [#allocation2]   ;;  %s298_s13 = scalar_lea.hbm %s467_s0, 1024 }
   0x3   :  { %s15_s10 = sshll.u32 %s370_s9, 4  ;;  %p299_p0 = scmp.ne.s32.totalorder %s467_s0, %s298_s13  ;;  %s16_s10 = int_to_ptr.vmem [resolvable:$true] %s15_s10 }
   0x4   :  { %p302_p1 = scmp.lt.u32.totalorder %s298_s13, %s467_s0 }
   0x6   :  { %p304_p2 = pnand %p302_p1, %p299_p0 }
   0x8   :  { %307 = shalt.err (!%p304_p2)
}
   0x9   :  { %s308_s18 = scalar_lea.vmem %s16_s10, 1024  ;;  %p313_p4 = scmp.lt.s32.totalorder %s16_s10, %s16_s10 }
   0xa   :  { %p309_p3 = scmp.ne.s32.totalorder %s16_s10, %s308_s18  ;;  %p314_p5 = scmp.lt.s32.totalorder %s308_s18, %s308_s18 }
   0xc   :  { %p315_p6 = por %p314_p5, %p313_p4 }
   0xe   :  { %p316_p7 = pnand %p315_p6, %p309_p3 }
  0x10   :  { %319 = shalt.err (!%p316_p7)
}
  0x11   :  { %s371_s19 = smov 64   ;;  %s372_s20 = smov 4  }
  0x12   :  { %21 = dma.hbm_to_vmem [thread:$0]  %s467_s0, 1024, %s16_s10, [#allocation3], %s371_s19, %s371_s19, %s372_s20  }
  0x13   :  { %s373_s23 = smov [#allocation5]   ;;  %s320_s27 = scalar_lea.hbm %s468_s1, 256 }
  0x14   :  { %s27_s24 = sshll.u32 %s373_s23, 4  ;;  %p321_p8 = scmp.ne.s32.totalorder %s468_s1, %s320_s27  ;;  %s28_s24 = int_to_ptr.vmem [resolvable:$true] %s27_s24 }
  0x15   :  { %p324_p9 = scmp.lt.u32.totalorder %s320_s27, %s468_s1 }
  0x17   :  { %p326_p10 = pnand %p324_p9, %p321_p8 }
  0x19   :  { %329 = shalt.err (!%p326_p10)
}
  0x1a   :  { %s330_s4 = scalar_lea.vmem %s28_s24, 256  ;;  %p335_p12 = scmp.lt.s32.totalorder %s28_s24, %s28_s24 }
  0x1b   :  { %p331_p11 = scmp.ne.s32.totalorder %s28_s24, %s330_s4  ;;  %p336_p13 = scmp.lt.s32.totalorder %s330_s4, %s330_s4 }
  0x1d   :  { %p337_p0 = por %p336_p13, %p335_p12 }
  0x1f   :  { %p338_p1 = pnand %p337_p0, %p331_p11 }
  0x21   :  { %341 = shalt.err (!%p338_p1)
}
  0x22   :  { %s374_s0 = smov 128   ;;  %s375_s5 = smov 8  }
  0x23   :  { %33 = dma.hbm_to_vmem [thread:$0]  %s468_s1, 256, %s28_s24, [#allocation6], %s374_s0, %s374_s0, %s375_s5  }
  0x24   :  { %364 = dma.done.wait [#allocation3], 1024  }
  0x25   :  { %365 = vsyncadd [#allocation3], 4294966272 }
  0x26   :  { %366 = dma.done.wait [#allocation6], 256  }
  0x27   :  { %367 = vsyncadd [#allocation6], 4294967040  ;;  %v64_v0 = vlaneseq  ;;  %v376_v1 = vmov 1966171168   ;;  %v40_v6 = vld [vmem:[#allocation5] sm:$0xff]  ;;  %v41_v13 = vld [vmem:[#allocation5 + $0x8] sm:$0xff] }
  0x28   :  { %v62_v2 = vunpack.c.l.s4 %v376_v1  ;;  %v60_v9 = vcombine.high %v40_v6, %v40_v6  ;;  %v42_v14 = vld [vmem:[#allocation2] sm:$0xf]  ;;  %v109_v16 = vcombine.high %v41_v13, %v41_v13  ;;  %v43_v21 = vld [vmem:[#allocation2 + $0x4] sm:$0xf]  ;;  %v44_v22 = vld [vmem:[#allocation2 + $0x8] sm:$0xf] }
  0x29   :  { %v65_v3 = vshrl.u32 %v64_v0, 7  ;;  %v46_v31 = vld [vmem:[#allocation2 + $0x10] sm:$0xf]  ;;  %v45_v32 = vld [vmem:[#allocation2 + $0xc] sm:$0xf]  ;;  %s377_s1 = smov [#allocation7]  }
  0x2a   :  { %v63_v4 = vunpack.c.0.s8 %v62_v2  ;;  %v50_v36 = vld [vmem:[#allocation2 + $0x20] sm:$0xf]  ;;  %v47_v41 = vld [vmem:[#allocation2 + $0x14] sm:$0xf]  ;;  %v48_v42 = vld [vmem:[#allocation2 + $0x18] sm:$0xf] }
  0x2b   :  { %v423_v8 = vsub.s32 0, %v65_v3  ;;  %v51_v48 = vld [vmem:[#allocation2 + $0x24] sm:$0xf]  ;;  %v49_v50 = vld [vmem:[#allocation2 + $0x1c] sm:$0xf]  ;;  %s275_s8 = sshll.u32 %s377_s1, 4  ;;  %s276_s8 = int_to_ptr.vmem [resolvable:$true] %s275_s8 }
  0x2c   :  { %v420_v5 = vsub.s32 %v63_v4, %v65_v3  ;;  %v52_v57 = vld [vmem:[#allocation2 + $0x28] sm:$0xf]  ;;  %v53_v61 = vld [vmem:[#allocation2 + $0x2c] sm:$0xf]  ;;  %v54_v2 = vld [vmem:[#allocation2 + $0x30] sm:$0xf]  ;;  %p347_p3 = scmp.lt.s32.totalorder %s276_s8, %s276_s8 }
  0x2d   :  { %s342_s9 = scalar_lea.vmem %s276_s8, 1024 }
  0x2e   :  { %v67_v7 = vrot.slane %v40_v6, %v420_v5  ;;  %v74_v12 = vrot.slane %v60_v9, %v420_v5  ;;  %v116_v15 = vrot.slane %v41_v13, %v420_v5  ;;  %v123_v26 = vrot.slane %v109_v16, %v420_v5  ;;  %v57_v16 = vld [vmem:[#allocation2 + $0x3c] sm:$0xf]  ;;  %p343_p2 = scmp.ne.s32.totalorder %s276_s8, %s342_s9  ;;  %p348_p4 = scmp.lt.s32.totalorder %s342_s9, %s342_s9 }
  0x30   :  { %v83_v10 = vrot.slane %v67_v7, %v420_v5  ;;  %v75_v11 = vcombine.high %v67_v7, %v67_v7  ;;  %v90_v20 = vrot.slane %v74_v12, %v420_v5  ;;  %v76_v23 = vcombine.high %v74_v12, %v74_v12  ;;  %p349_p5 = por %p348_p4, %p347_p3 }
  0x31   :  { %v132_v24 = vrot.slane %v116_v15, %v420_v5  ;;  %v124_v25 = vcombine.high %v116_v15, %v116_v15  ;;  %v139_v62 = vrot.slane %v123_v26, %v420_v5  ;;  %v125_v63 = vcombine.high %v123_v26, %v123_v26 }
  0x32   :  { %v161_v17 = vrot.slane %v83_v10, %v423_v8  ;;  %v97_v18 = vrot.slane %v75_v11, %v420_v5  ;;  %v105_v19 = vcombine.high %v83_v10, %v83_v10  ;;  %v177_v33 = vrot.slane %v90_v20, %v423_v8  ;;  %v55_v10 = vld [vmem:[#allocation2 + $0x34] sm:$0xf]  ;;  %v56_v11 = vld [vmem:[#allocation2 + $0x38] sm:$0xf]  ;;  %p350_p6 = pnand %p349_p5, %p343_p2 }
  0x33   :  { %v104_v34 = vrot.slane %v76_v23, %v420_v5  ;;  %v106_v35 = vcombine.high %v90_v20, %v90_v20  ;;  %v193_v37 = vrot.slane %v132_v24, %v423_v8  ;;  %v146_v43 = vrot.slane %v124_v25, %v420_v5 }
  0x34   :  { %v238_v27 = vadd.f32 %v161_v17, %v42_v14  ;;  %v165_v28 = vrot.slane %v97_v18, %v423_v8  ;;  %v169_v29 = vrot.slane %v105_v19, %v423_v8  ;;  %v107_v30 = vcombine.high %v97_v18, %v97_v18 }
  0x35   :  { %v242_v44 = vadd.f32 %v177_v33, %v46_v31  ;;  %v181_v45 = vrot.slane %v104_v34, %v423_v8  ;;  %v185_v46 = vrot.slane %v106_v35, %v423_v8  ;;  %v108_v47 = vcombine.high %v104_v34, %v104_v34 }
  0x36   :  { %254 = vst [vmem:[#allocation7] sm:$0xf] %v238_v27  ;;  %v239_v38 = vadd.f32 %v165_v28, %v43_v21  ;;  %v240_v39 = vadd.f32 %v169_v29, %v44_v22  ;;  %v173_v40 = vrot.slane %v107_v30, %v423_v8  ;;  %v246_v51 = vadd.f32 %v193_v37, %v50_v36 }
  0x37   :  { %v197_v52 = vrot.slane %v146_v43, %v423_v8  ;;  %v154_v53 = vcombine.high %v132_v24, %v132_v24  ;;  %258 = vst [vmem:[#allocation7 + $0x10] sm:$0xf] %v242_v44  ;;  %v243_v54 = vadd.f32 %v181_v45, %v47_v41  ;;  %v244_v55 = vadd.f32 %v185_v46, %v48_v42 }
  0x38   :  { %255 = vst [vmem:[#allocation7 + $0x4] sm:$0xf] %v239_v38  ;;  %256 = vst [vmem:[#allocation7 + $0x8] sm:$0xf] %v240_v39  ;;  %v241_v49 = vadd.f32 %v173_v40, %v45_v32  ;;  %v189_v56 = vrot.slane %v108_v47, %v423_v8  ;;  %v156_v58 = vcombine.high %v146_v43, %v146_v43 }
  0x39   :  { %262 = vst [vmem:[#allocation7 + $0x20] sm:$0xf] %v246_v51  ;;  %v247_v59 = vadd.f32 %v197_v52, %v51_v48  ;;  %v201_v60 = vrot.slane %v154_v53, %v423_v8  ;;  %259 = vst [vmem:[#allocation7 + $0x14] sm:$0xf] %v243_v54  ;;  %v209_v4 = vrot.slane %v139_v62, %v423_v8 }
  0x3a   :  { %257 = vst [vmem:[#allocation7 + $0xc] sm:$0xf] %v241_v49  ;;  %260 = vst [vmem:[#allocation7 + $0x18] sm:$0xf] %v244_v55  ;;  %v245_v0 = vadd.f32 %v189_v56, %v49_v50  ;;  %v205_v1 = vrot.slane %v156_v58, %v423_v8  ;;  %v153_v6 = vrot.slane %v125_v63, %v420_v5 }
  0x3b   :  { %263 = vst [vmem:[#allocation7 + $0x24] sm:$0xf] %v247_v59  ;;  %v248_v3 = vadd.f32 %v201_v60, %v52_v57  ;;  %v155_v7 = vcombine.high %v139_v62, %v139_v62  ;;  %v250_v12 = vadd.f32 %v209_v4, %v54_v2 }
  0x3c   :  { %261 = vst [vmem:[#allocation7 + $0x1c] sm:$0xf] %v245_v0  ;;  %v249_v9 = vadd.f32 %v205_v1, %v53_v61  ;;  %v213_v13 = vrot.slane %v153_v6, %v423_v8  ;;  %v157_v15 = vcombine.high %v153_v6, %v153_v6 }
  0x3d   :  { %264 = vst [vmem:[#allocation7 + $0x28] sm:$0xf] %v248_v3  ;;  %v217_v14 = vrot.slane %v155_v7, %v423_v8  ;;  %266 = vst [vmem:[#allocation7 + $0x30] sm:$0xf] %v250_v12 }
  0x3e   :  { %265 = vst [vmem:[#allocation7 + $0x2c] sm:$0xf] %v249_v9  ;;  %v251_v17 = vadd.f32 %v213_v13, %v55_v10  ;;  %v221_v5 = vrot.slane %v157_v15, %v423_v8 }
  0x3f   :  { %v252_v18 = vadd.f32 %v217_v14, %v56_v11 }
  0x40   :  { %267 = vst [vmem:[#allocation7 + $0x34] sm:$0xf] %v251_v17  ;;  %v253_v19 = vadd.f32 %v221_v5, %v57_v16 }
  0x41   :  { %268 = vst [vmem:[#allocation7 + $0x38] sm:$0xf] %v252_v18 }
  0x42   :  { %269 = vst [vmem:[#allocation7 + $0x3c] sm:$0xf] %v253_v19 }
  0x43   :  { %353 = shalt.err (!%p350_p6)
}
  0x44   :  { %s354_s12 = scalar_lea.hbm %s469_s2, 1024 }
  0x45   :  { %p355_p7 = scmp.ne.s32.totalorder %s469_s2, %s354_s12  ;;  %p358_p8 = scmp.lt.u32.totalorder %s354_s12, %s469_s2 }
  0x47   :  { %p360_p9 = pnand %p358_p8, %p355_p7 }
  0x49   :  { %363 = shalt.err (!%p360_p9)
}
  0x4a   :  { %281 = dma.vmem_to_hbm [thread:$0]  %s276_s8, 1024, %s469_s2, [#allocation4], %s371_s19, %s371_s19, %s372_s20  }
  0x4b   :  { %368 = dma.done.wait [#allocation4], 1024  }
  0x4c   :  { %369 = vsyncadd [#allocation4], 4294966272 }
  0x4d   :  { %285 = vsyncpa [#allocation3], 1 }
  0x4e   :  { %286 = vsyncpa [#allocation6], 1 }
  0x4f   :  { %287 = vsyncpa [#allocation4], 1 }

</bundles_post_ra>
